<compile_context>
chip_gen: v5e
topology: v5e:2x2
jax: 0.10.0
libtpu: 0.0.40
codegen_flags: <defaults>
</compile_context>

<pallas_src>
import jax
import jax.numpy as jnp
from jax.experimental import pallas as pl
from jax.experimental.pallas import tpu as pltpu

FEAT_DIM = 2
NUM_CLASSES = 10
H_PAD = 128          # hidden width 120 padded to one full lane tile
C_PAD = 16           # folded output width 12 padded to a sublane multiple


def _round_up(n, m):
    return ((n + m - 1) // m) * m


def mainnet_kernel(x_ref, w1_ref, b1_ref, alpha_ref, wc_ref, bc_ref, out_ref):
    # x tile: (TILE_B, 784) in its stored dtype; cast to bf16 for the MXU here
    # (avoids a separate host-side cast pass over HBM).
    x = x_ref[...].astype(jnp.bfloat16)

    # hidden_layer[0]: Linear(784, 120) padded to 128 lanes, f32 accumulation.
    h = jnp.dot(x, w1_ref[...], preferred_element_type=jnp.float32) + b1_ref[...]

    # hidden_layer[1]: PReLU (single shared scalar kept in SMEM).
    alpha = alpha_ref[0, 0]
    h = jnp.where(h > 0, h, alpha * h)

    # Folded Linear(120,2) + Linear(2,10), computed transposed so the output
    # block is (16, TILE_B):  out[c, b] = sum_k wc[k, c] * h[b, k] + bc[c].
    out_ref[...] = (
        jax.lax.dot_general(
            wc_ref[...],
            h.astype(jnp.bfloat16),
            dimension_numbers=(((0,), (1,)), ((), ())),
            preferred_element_type=jnp.float32,
        )
        + bc_ref[...]
    )


def mainnet_forward(x, params, tile_b=2048):
    B = x.shape[0]
    w1, b1, alpha, w2, b2, w3, b3 = params

    # --- host-side (tiny) weight preprocessing ----------------------------
    # Fold layers 2 and 3 into a single matmul: (120, 12) / (1, 12).
    wc = jnp.concatenate([w2, w2 @ w3], axis=1)
    bc = jnp.concatenate([b2, b2 @ w3 + b3], axis=1)

    # Pad to 128-aligned MXU shapes (padded rows/cols are zero -> exact).
    w1p = jnp.pad(w1, ((0, 0), (0, H_PAD - w1.shape[1]))).astype(jnp.bfloat16)    # (784,128)
    b1p = jnp.pad(b1, ((0, 0), (0, H_PAD - b1.shape[1]))).astype(jnp.float32)     # (1,128)
    wcp = jnp.pad(
        wc, ((0, H_PAD - wc.shape[0]), (0, C_PAD - wc.shape[1]))
    ).astype(jnp.bfloat16)                                                        # (128,16)
    bcp = jnp.pad(bc, ((0, 0), (0, C_PAD - bc.shape[1]))).astype(jnp.float32).T   # (16,1)

    # --- batch tiling ------------------------------------------------------
    # Tile is a multiple of 128 (lane-dense transposed output, clean sublane
    # packing).  Clamp so a large batch always gets >= 2 grid steps (v7x
    # megacore); x itself is never padded or copied on the host.
    tile_b = max(128, _round_up(tile_b, 128))
    tb = max(128, min(tile_b, _round_up(pl.cdiv(B, 2), 128)))
    n_blocks = pl.cdiv(B, tb)
    Bp = n_blocks * tb            # output width (>= B); extra cols sliced off

    out_t = pl.pallas_call(
        mainnet_kernel,
        grid=(n_blocks,),
        out_shape=jax.ShapeDtypeStruct((C_PAD, Bp), jnp.float32),
        in_specs=[
            pl.BlockSpec((tb, 784), lambda i: (i, 0)),            # x (streamed, f32)
            pl.BlockSpec((784, H_PAD), lambda i: (0, 0)),         # w1 (resident, bf16)
            pl.BlockSpec((1, H_PAD), lambda i: (0, 0)),           # b1
            pl.BlockSpec(memory_space=pltpu.MemorySpace.SMEM),    # PReLU alpha scalar
            pl.BlockSpec((H_PAD, C_PAD), lambda i: (0, 0)),       # folded Wc (bf16)
            pl.BlockSpec((C_PAD, 1), lambda i: (0, 0)),           # folded bc (transposed)
        ],
        out_specs=pl.BlockSpec((C_PAD, tb), lambda i: (0, i)),    # (16, tb) lane-dense
        compiler_params=pltpu.CompilerParams(
            dimension_semantics=("parallel",),
            vmem_limit_bytes=48 << 20,
        ),
    )(x, w1p, b1p, alpha, wcp, bcp)

    # One contiguous slice of the useful rows / valid batch, then split.
    fo = out_t[: FEAT_DIM + NUM_CLASSES, :B].T        # (B, 12)
    features = fo[:, :FEAT_DIM]
    outputs = fo[:, FEAT_DIM:FEAT_DIM + NUM_CLASSES]
    return features, outputs


def init_params(key):
    """Deterministic synthetic parameters with the shapes nn.Linear implies.

    Weights are stored transposed to (in, out) for the kernel.
    """
    k1, k2, k3, k4, k5, k6 = jax.random.split(key, 6)
    s1 = 1.0 / jnp.sqrt(784.0)
    s2 = 1.0 / jnp.sqrt(120.0)
    s3 = 1.0 / jnp.sqrt(2.0)
    w1 = jax.random.uniform(k1, (784, 120), jnp.float32, -s1, s1)
    b1 = jax.random.uniform(k2, (1, 120), jnp.float32, -s1, s1)
    alpha = jnp.full((1, 1), 0.25, jnp.float32)           # PReLU default init
    w2 = jax.random.uniform(k3, (120, 2), jnp.float32, -s2, s2)
    b2 = jax.random.uniform(k4, (1, 2), jnp.float32, -s2, s2)
    w3 = jax.random.uniform(k5, (2, 10), jnp.float32, -s3, s3)
    b3 = jax.random.uniform(k6, (1, 10), jnp.float32, -s3, s3)
    return (w1, b1, alpha, w2, b2, w3, b3)


def reference_forward(x, params):
    """Plain-JAX reference of MainNet.forward.

    Matches the kernel's dtype strategy (bf16 operands, f32 accumulation, and
    the exact layer-2/3 fold) so the comparison isolates kernel correctness.
    A pure-f32 PyTorch model differs from this only by bf16 rounding noise.
    """
    w1, b1, alpha, w2, b2, w3, b3 = params
    h = jnp.dot(x.astype(jnp.bfloat16), w1.astype(jnp.bfloat16),
                preferred_element_type=jnp.float32) + b1
    h = jnp.where(h > 0, h, alpha[0, 0] * h)
    wc = jnp.concatenate([w2, w2 @ w3], axis=1).astype(jnp.bfloat16)   # (120, 12)
    bc = jnp.concatenate([b2, b2 @ w3 + b3], axis=1)                   # (1, 12)
    fo = jnp.dot(h.astype(jnp.bfloat16), wc,
                 preferred_element_type=jnp.float32) + bc
    return fo[:, :FEAT_DIM], fo[:, FEAT_DIM:FEAT_DIM + NUM_CLASSES]


# TODO(synk): MainNet.getloss (CrossEntropyLoss + CenterLoss with torch.histc)
# is not part of forward(); it is not implemented here.

if __name__ == "__main__":
    key = jax.random.PRNGKey(0)
    kp, kx = jax.random.split(key)
    params = init_params(kp)

    B = 8
    x = jax.random.normal(kx, (B, 784), jnp.float32)   # flattened 28x28 MNIST-like input

    features, outputs = mainnet_forward(x, params)
    jax.block_until_ready((features, outputs))

    f_ref, o_ref = reference_forward(x, params)
    assert features.shape == (B, 2) and outputs.shape == (B, 10)
    assert jnp.allclose(features, f_ref, atol=2e-3, rtol=2e-3)
    assert jnp.allclose(outputs, o_ref, atol=2e-3, rtol=2e-3)

    print("KERNEL_OK")
</pallas_src>

<mosaic_0001>
module attributes {stable_mosaic.version = 11 : i64} {
  func.func @mainnet_kernel(%arg0: i32, %arg1: memref<128x784xf32, #tpu.memory_space<vmem>>, %arg2: memref<784x128xbf16, #tpu.memory_space<vmem>>, %arg3: memref<1x128xf32, #tpu.memory_space<vmem>>, %arg4: memref<1x1xf32, #tpu.memory_space<smem>>, %arg5: memref<128x16xbf16, #tpu.memory_space<vmem>>, %arg6: memref<16x1xf32, #tpu.memory_space<vmem>>, %arg7: memref<16x128xf32, #tpu.memory_space<vmem>>) attributes {dimension_semantics = [#tpu.dimension_semantics<parallel>], iteration_bounds = array<i64: 1>, scalar_prefetch = 0 : i64, scratch_operands = 0 : i64, tpu.core_type = #tpu.core_type<tc>, window_params = [{transform_indices = @transform_0, window_bounds = array<i64: 128, 784>}, {pipeline_mode = #tpu.pipeline_mode<synchronous>, transform_indices = @transform_1, window_bounds = array<i64: 784, 128>}, {pipeline_mode = #tpu.pipeline_mode<synchronous>, transform_indices = @transform_2, window_bounds = array<i64: 1, 128>}, {transform_indices = @transform_3, window_bounds = array<i64: 1, 1>}, {pipeline_mode = #tpu.pipeline_mode<synchronous>, transform_indices = @transform_4, window_bounds = array<i64: 128, 16>}, {pipeline_mode = #tpu.pipeline_mode<synchronous>, transform_indices = @transform_5, window_bounds = array<i64: 16, 1>}, {transform_indices = @transform_6, window_bounds = array<i64: 16, 128>}]} {
    %c0 = arith.constant 0 : index
    %c0_0 = arith.constant 0 : index
    %0 = vector.load %arg1[%c0, %c0_0] : memref<128x784xf32, #tpu.memory_space<vmem>>, vector<128x784xf32>
    %1 = arith.truncf %0 : vector<128x784xf32> to vector<128x784xbf16>
    %c0_1 = arith.constant 0 : index
    %c0_2 = arith.constant 0 : index
    %2 = vector.load %arg2[%c0_1, %c0_2] : memref<784x128xbf16, #tpu.memory_space<vmem>>, vector<784x128xbf16>
    %cst = arith.constant dense<0.000000e+00> : vector<128x128xf32>
    %3 = tpu.matmul %1, %2, %cst {dimension_numbers = #tpu.dot_dimension_numbers<[1], [0], [0], [1], [0, 0, 1, 1], [], []>} : vector<128x784xbf16>, vector<784x128xbf16>, vector<128x128xf32> -> vector<128x128xf32>
    %c0_3 = arith.constant 0 : index
    %c0_4 = arith.constant 0 : index
    %4 = vector.load %arg3[%c0_3, %c0_4] : memref<1x128xf32, #tpu.memory_space<vmem>>, vector<1x128xf32>
    %5 = vector.broadcast %4 : vector<1x128xf32> to vector<128x128xf32>
    %6 = arith.addf %3, %5 : vector<128x128xf32>
    %c0_5 = arith.constant 0 : index
    %c0_6 = arith.constant 0 : index
    %7 = memref.load %arg4[%c0_5, %c0_6] : memref<1x1xf32, #tpu.memory_space<smem>>
    %cst_7 = arith.constant 0.000000e+00 : f32
    %8 = vector.broadcast %cst_7 : f32 to vector<128x128xf32>
    %9 = arith.cmpf ogt, %6, %8 : vector<128x128xf32>
    %10 = vector.broadcast %7 : f32 to vector<128x128xf32>
    %11 = arith.mulf %10, %6 : vector<128x128xf32>
    %12 = arith.select %9, %6, %11 : vector<128x128xi1>, vector<128x128xf32>
    %c0_8 = arith.constant 0 : index
    %c0_9 = arith.constant 0 : index
    %13 = vector.load %arg5[%c0_8, %c0_9] : memref<128x16xbf16, #tpu.memory_space<vmem>>, vector<128x16xbf16>
    %14 = arith.truncf %12 : vector<128x128xf32> to vector<128x128xbf16>
    %cst_10 = arith.constant dense<0.000000e+00> : vector<16x128xf32>
    %15 = tpu.matmul %13, %14, %cst_10 {dimension_numbers = #tpu.dot_dimension_numbers<[0], [1], [1], [0], [0, 1, 1, 0], [], []>} : vector<128x16xbf16>, vector<128x128xbf16>, vector<16x128xf32> -> vector<16x128xf32>
    %c0_11 = arith.constant 0 : index
    %c0_12 = arith.constant 0 : index
    %16 = vector.load %arg6[%c0_11, %c0_12] : memref<16x1xf32, #tpu.memory_space<vmem>>, vector<16x1xf32>
    %17 = vector.broadcast %16 : vector<16x1xf32> to vector<16x128xf32>
    %18 = arith.addf %15, %17 : vector<16x128xf32>
    %c0_13 = arith.constant 0 : index
    %c0_14 = arith.constant 0 : index
    %19 = vector.load %arg7[%c0_13, %c0_14] : memref<16x128xf32, #tpu.memory_space<vmem>>, vector<16x128xf32>
    tpu.vector_store %arg7[%c0_13, %c0_14], %18 {strides = array<i32>} : memref<16x128xf32, #tpu.memory_space<vmem>>, vector<16x128xf32>,
    return
  }
  func.func @transform_0(%arg0: i32) -> (i32, i32) {
    %c0_i32 = arith.constant 0 : i32
    %c0_i32_0 = arith.constant 0 : i32
    return %arg0, %c0_i32 : i32, i32
  }
  func.func @transform_1(%arg0: i32) -> (i32, i32) {
    %c0_i32 = arith.constant 0 : i32
    %c0_i32_0 = arith.constant 0 : i32
    %c0_i32_1 = arith.constant 0 : i32
    return %c0_i32, %c0_i32_0 : i32, i32
  }
  func.func @transform_2(%arg0: i32) -> (i32, i32) {
    %c0_i32 = arith.constant 0 : i32
    %c0_i32_0 = arith.constant 0 : i32
    %c0_i32_1 = arith.constant 0 : i32
    return %c0_i32, %c0_i32_0 : i32, i32
  }
  func.func @transform_3(%arg0: i32) -> (i32, i32) {
    %c0_i32 = arith.constant 0 : i32
    %c0_i32_0 = arith.constant 0 : i32
    %c0_i32_1 = arith.constant 0 : i32
    return %c0_i32, %c0_i32_0 : i32, i32
  }
  func.func @transform_4(%arg0: i32) -> (i32, i32) {
    %c0_i32 = arith.constant 0 : i32
    %c0_i32_0 = arith.constant 0 : i32
    %c0_i32_1 = arith.constant 0 : i32
    return %c0_i32, %c0_i32_0 : i32, i32
  }
  func.func @transform_5(%arg0: i32) -> (i32, i32) {
    %c0_i32 = arith.constant 0 : i32
    %c0_i32_0 = arith.constant 0 : i32
    %c0_i32_1 = arith.constant 0 : i32
    return %c0_i32, %c0_i32_0 : i32, i32
  }
  func.func @transform_6(%arg0: i32) -> (i32, i32) {
    %c0_i32 = arith.constant 0 : i32
    %c0_i32_0 = arith.constant 0 : i32
    return %c0_i32, %arg0 : i32, i32
  }
}

</mosaic_0001>

<bundles_post_ra>
// kernel: tpu_custom_call.1
= control target key start
LH: loop header
LB: loop body
LE: loop exit
PB: predicated region body
PF: predicated region fallthrough
CT: control target
= control target key end

     0   :  { %12 = vsyncpa [#allocation4], 0  ;;  %s2160_s0 = inlined_call_operand.vmem [shape: f32[8,784], index: 0, kind: input, shape index: {}]   ;;  %s2161_s1 = inlined_call_operand.hbm [shape: bf16[784,128], index: 1, kind: input, shape index: {}]   ;;  %s2162_s2 = inlined_call_operand.vmem [shape: f32[1,128], index: 2, kind: input, shape index: {}]   ;;  %s2163_s3 = inlined_call_operand.<no memory space> [shape: f32[1,1], index: 3, kind: input, shape index: {}]   ;;  %s2164_s4 = inlined_call_operand.vmem [shape: bf16[128,16], index: 4, kind: input, shape index: {}]   ;;  %s2165_s5 = inlined_call_operand.vmem [shape: f32[16,1], index: 5, kind: input, shape index: {}]   ;;  %s2166_s6 = inlined_call_operand.hbm [shape: f32[16,128], index: 6, kind: output, shape index: {}]  }
   0x1   :  { %13 = vsyncpa [#allocation5], 0  ;;  %s20_s23 = sshll.u32 %s2161_s1, 4  ;;  %s1544_s24 = smov [#allocation3]   ;;  %s21_s23 = int_to_ptr.hbm [resolvable:$true] %s20_s23 }
   0x2   :  { %s22_s25 = sshll.u32 %s1544_s24, 4  ;;  %s1545_s26 = smov 64   ;;  %s23_s25 = int_to_ptr.vmem [resolvable:$true] %s22_s25 }
   0x3   :  { %s1546_s27 = smov 4  }
   0x4   :  { %28 = dma.hbm_to_vmem [thread:$0]  %s21_s23, 6272, %s23_s25, [#allocation4], %s1545_s26, %s1545_s26, %s1546_s27  }
   0x5   :  { %1540 = dma.done.wait [#allocation4], 6272  }
   0x6   :  { %1541 = vsyncadd [#allocation4], 4294961024  ;;  %v1402_v0 = vld [vmem:[#allocation3 + $0x38] sm:$0xff]  ;;  %v1401_v3 = vld [vmem:[#allocation3 + $0x30] sm:$0xff]  ;;  %vm606_vm0 = vcmask 130048   ;;  %s1548_s18 = smov [#allocation6]  }
   0x7   :  { %v1410_v1 = vld [vmem:[#allocation3 + $0x78] sm:$0xff]  ;;  %631 = vmatpush.bf16.msra.mxu0 %v1402_v0  ;;  %1452 = vmatpush.bf16.msra.mxu3 %v1402_v0  ;;  %v1409_v4 = vld [vmem:[#allocation3 + $0x70] sm:$0xff]  ;;  %v1400_v6 = vld [vmem:[#allocation3 + $0x28] sm:$0xff]  ;;  %s1144_s19 = sshll.u32 %s1548_s18, 4  ;;  %s1549_s22 = smov 128   ;;  %s1145_s19 = int_to_ptr.vmem [resolvable:$true] %s1144_s19 }
   0x8   :  { %v1418_v2 = vld [vmem:[#allocation3 + $0xb8] sm:$0xff]  ;;  %680 = vmatpush.bf16.msra.mxu1 %v1410_v1  ;;  %v1417_v5 = vld [vmem:[#allocation3 + $0xb0] sm:$0xff]  ;;  %v1408_v7 = vld [vmem:[#allocation3 + $0x68] sm:$0xff]  ;;  %s1550_s23 = smov 8  }
   0x9   :  { %729 = vmatpush.bf16.msra.mxu2 %v1418_v2  ;;  %v1416_v8 = vld [vmem:[#allocation3 + $0xa8] sm:$0xff]  ;;  %v1399_v9 = vld [vmem:[#allocation3 + $0x20] sm:$0xff]  ;;  %v1398_v12 = vld [vmem:[#allocation3 + $0x18] sm:$0xff] }
   0xa   :  { %v1407_v10 = vld [vmem:[#allocation3 + $0x60] sm:$0xff]  ;;  %v1406_v13 = vld [vmem:[#allocation3 + $0x58] sm:$0xff]  ;;  %v1397_v15 = vld [vmem:[#allocation3 + $0x10] sm:$0xff] }
   0xb   :  { %632 = vmatpush.bf16.msra.mxu0 %v1401_v3  ;;  %1453 = vmatpush.bf16.msra.mxu3 %v1401_v3  ;;  %v1415_v11 = vld [vmem:[#allocation3 + $0xa0] sm:$0xff]  ;;  %v1414_v14 = vld [vmem:[#allocation3 + $0x98] sm:$0xff]  ;;  %v1405_v16 = vld [vmem:[#allocation3 + $0x50] sm:$0xff] }
   0xc   :  { %681 = vmatpush.bf16.msra.mxu1 %v1409_v4  ;;  %v1413_v17 = vld [vmem:[#allocation3 + $0x90] sm:$0xff]  ;;  %v1396_v18 = vld [vmem:[#allocation3 + $0x8] sm:$0xff]  ;;  %v1395_v21 = vld [vmem:[#allocation3] sm:$0xff] }
   0xd   :  { %730 = vmatpush.bf16.msra.mxu2 %v1417_v5  ;;  %v1404_v19 = vld [vmem:[#allocation3 + $0x48] sm:$0xff]  ;;  %v1403_v22 = vld [vmem:[#allocation3 + $0x40] sm:$0xff]  ;;  %v49_v25 = vld [vmem:[%s2160_s0 + $0x38] sm:$0xff] }
   0xe   :  { %v1412_v20 = vld [vmem:[#allocation3 + $0x88] sm:$0xff]  ;;  %v1411_v23 = vld [vmem:[#allocation3 + $0x80] sm:$0xff]  ;;  %v77_v27 = vld [vmem:[%s2160_s0 + $0x118] sm:$0xff] }
   0xf   :  { %633 = vmatpush.bf16.msra.mxu0 %v1400_v6  ;;  %1454 = vmatpush.bf16.msra.mxu3 %v1400_v6  ;;  %v42_v24 = vld [vmem:[%s2160_s0] sm:$0xff]  ;;  %v43_v28 = vld [vmem:[%s2160_s0 + $0x8] sm:$0xff]  ;;  %v44_v30 = vld [vmem:[%s2160_s0 + $0x10] sm:$0xff] }
  0x10   :  { %682 = vmatpush.bf16.msra.mxu1 %v1408_v7  ;;  %v70_v26 = vld [vmem:[%s2160_s0 + $0xe0] sm:$0xff]  ;;  %v51_v31 = vld [vmem:[%s2160_s0 + $0x48] sm:$0xff]  ;;  %v1434_v32 = vld [vmem:[#allocation3 + $0x138] sm:$0xff]  ;;  %v154_v33 = vpack.c.bf16 %v49_v25, %v42_v24 }
  0x11   :  { %731 = vmatpush.bf16.msra.mxu2 %v1416_v8  ;;  %v50_v29 = vld [vmem:[%s2160_s0 + $0x40] sm:$0xff]  ;;  %v168_v34 = vpack.c.bf16 %v77_v27, %v70_v26  ;;  %v156_v36 = vpack.c.bf16 %v51_v31, %v44_v30  ;;  %v1433_v37 = vld [vmem:[#allocation3 + $0x130] sm:$0xff]  ;;  %v1432_v38 = vld [vmem:[#allocation3 + $0x128] sm:$0xff] }
  0x12   :  { %v155_v35 = vpack.c.bf16 %v50_v29, %v43_v28  ;;  %v1431_v39 = vld [vmem:[#allocation3 + $0x120] sm:$0xff]  ;;  %v56_v40 = vld [vmem:[%s2160_s0 + $0x70] sm:$0xff]  ;;  %v63_v41 = vld [vmem:[%s2160_s0 + $0xa8] sm:$0xff] }
  0x13   :  { %634 = vmatpush.bf16.msra.mxu0 %v1399_v9  ;;  %1455 = vmatpush.bf16.msra.mxu3 %v1399_v9  ;;  %v84_v42 = vld [vmem:[%s2160_s0 + $0x150] sm:$0xff]  ;;  %v91_v43 = vld [vmem:[%s2160_s0 + $0x188] sm:$0xff]  ;;  %v57_v44 = vld [vmem:[%s2160_s0 + $0x78] sm:$0xff]  ;;  %v161_v49 = vpack.c.bf16 %v63_v41, %v56_v40 }
  0x14   :  { %683 = vmatpush.bf16.msra.mxu1 %v1407_v10  ;;  %v64_v45 = vld [vmem:[%s2160_s0 + $0xb0] sm:$0xff]  ;;  %v58_v46 = vld [vmem:[%s2160_s0 + $0x80] sm:$0xff]  ;;  %v65_v47 = vld [vmem:[%s2160_s0 + $0xb8] sm:$0xff]  ;;  %v175_v50 = vpack.c.bf16 %v91_v43, %v84_v42 }
  0x15   :  { %732 = vmatpush.bf16.msra.mxu2 %v1415_v11  ;;  %v1430_v48 = vld [vmem:[#allocation3 + $0x118] sm:$0xff]  ;;  %v162_v51 = vpack.c.bf16 %v64_v45, %v57_v44  ;;  %v163_v52 = vpack.c.bf16 %v65_v47, %v58_v46  ;;  %v1429_v53 = vld [vmem:[#allocation3 + $0x110] sm:$0xff]  ;;  %v1428_v54 = vld [vmem:[#allocation3 + $0x108] sm:$0xff] }
  0x16   :  { %v1427_v55 = vld [vmem:[#allocation3 + $0x100] sm:$0xff]  ;;  %v105_v57 = vld [vmem:[%s2160_s0 + $0x1f8] sm:$0xff]  ;;  %v71_v58 = vld [vmem:[%s2160_s0 + $0xe8] sm:$0xff] }
  0x17   :  { %635 = vmatpush.bf16.msra.mxu0 %v1398_v12  ;;  %1456 = vmatpush.bf16.msra.mxu3 %v1398_v12  ;;  %v98_v56 = vld [vmem:[%s2160_s0 + $0x1c0] sm:$0xff]  ;;  %v53_v60 = vld [vmem:[%s2160_s0 + $0x58] sm:$0xff]  ;;  %v72_v62 = vld [vmem:[%s2160_s0 + $0xf0] sm:$0xff] }
  0x18   :  { %684 = vmatpush.bf16.msra.mxu1 %v1406_v13  ;;  %v46_v59 = vld [vmem:[%s2160_s0 + $0x20] sm:$0xff]  ;;  %v79_v63 = vld [vmem:[%s2160_s0 + $0x128] sm:$0xff]  ;;  %v182_v0 = vpack.c.bf16 %v105_v57, %v98_v56  ;;  %v1426_v4 = vld [vmem:[#allocation3 + $0xf8] sm:$0xff] }
  0x19   :  { %733 = vmatpush.bf16.msra.mxu2 %v1414_v14  ;;  %v78_v61 = vld [vmem:[%s2160_s0 + $0x120] sm:$0xff]  ;;  %v158_v1 = vpack.c.bf16 %v53_v60, %v46_v59  ;;  %v170_v3 = vpack.c.bf16 %v79_v63, %v72_v62  ;;  %v1442_v6 = vld [vmem:[#allocation3 + $0x178] sm:$0xff]  ;;  %v1425_v7 = vld [vmem:[#allocation3 + $0xf0] sm:$0xff] }
  0x1a   :  { %v169_v2 = vpack.c.bf16 %v78_v61, %v71_v58  ;;  %v1662_v5 = vld [vmem:[#allocation3 + $0x180] sm:$0xff]  ;;  %v1424_v8 = vld [vmem:[#allocation3 + $0xe8] sm:$0xff]  ;;  %v112_v9 = vld [vmem:[%s2160_s0 + $0x230] sm:$0xff] }
  0x1b   :  { %636 = vmatpush.bf16.msra.mxu0 %v1397_v15  ;;  %1457 = vmatpush.bf16.msra.mxu3 %v1397_v15  ;;  %v119_v10 = vld [vmem:[%s2160_s0 + $0x268] sm:$0xff]  ;;  %v85_v11 = vld [vmem:[%s2160_s0 + $0x158] sm:$0xff]  ;;  %v92_v12 = vld [vmem:[%s2160_s0 + $0x190] sm:$0xff] }
  0x1c   :  { %685 = vmatpush.bf16.msra.mxu1 %v1405_v16  ;;  %v60_v13 = vld [vmem:[%s2160_s0 + $0x90] sm:$0xff]  ;;  %v67_v14 = vld [vmem:[%s2160_s0 + $0xc8] sm:$0xff]  ;;  %v86_v15 = vld [vmem:[%s2160_s0 + $0x160] sm:$0xff] }
  0x1d   :  { %734 = vmatpush.bf16.msra.mxu2 %v1413_v17  ;;  %v93_v16 = vld [vmem:[%s2160_s0 + $0x198] sm:$0xff]  ;;  %v1423_v17 = vld [vmem:[#allocation3 + $0xe0] sm:$0xff]  ;;  %v1421_v24 = vld [vmem:[#allocation3 + $0xd0] sm:$0xff] }
  0x1e   :  { %v1420_v25 = vld [vmem:[#allocation3 + $0xc8] sm:$0xff]  ;;  %v126_v26 = vld [vmem:[%s2160_s0 + $0x2a0] sm:$0xff]  ;;  %v133_v27 = vld [vmem:[%s2160_s0 + $0x2d8] sm:$0xff] }
  0x1f   :  { %637 = vmatpush.bf16.msra.mxu0 %v1396_v18  ;;  %1458 = vmatpush.bf16.msra.mxu3 %v1396_v18  ;;  %v189_v18 = vpack.c.bf16 %v119_v10, %v112_v9  ;;  %v99_v28 = vld [vmem:[%s2160_s0 + $0x1c8] sm:$0xff]  ;;  %v106_v29 = vld [vmem:[%s2160_s0 + $0x200] sm:$0xff]  ;;  %v81_v31 = vld [vmem:[%s2160_s0 + $0x138] sm:$0xff] }
  0x20   :  { %686 = vmatpush.bf16.msra.mxu1 %v1404_v19  ;;  %v165_v19 = vpack.c.bf16 %v67_v14, %v60_v13  ;;  %v74_v30 = vld [vmem:[%s2160_s0 + $0x100] sm:$0xff]  ;;  %v140_v41 = vld [vmem:[%s2160_s0 + $0x310] sm:$0xff]  ;;  %v147_v42 = vld [vmem:[%s2160_s0 + $0x348] sm:$0xff] }
  0x21   :  { %735 = vmatpush.bf16.msra.mxu2 %v1412_v20  ;;  %v176_v20 = vpack.c.bf16 %v92_v12, %v85_v11  ;;  %v1439_v40 = vld [vmem:[#allocation3 + $0x160] sm:$0xff]  ;;  %v113_v43 = vld [vmem:[%s2160_s0 + $0x238] sm:$0xff]  ;;  %v88_v44 = vld [vmem:[%s2160_s0 + $0x170] sm:$0xff] }
  0x22   :  { %v95_v45 = vld [vmem:[%s2160_s0 + $0x1a8] sm:$0xff]  ;;  %v120_v46 = vld [vmem:[%s2160_s0 + $0x270] sm:$0xff]  ;;  %v114_v47 = vld [vmem:[%s2160_s0 + $0x240] sm:$0xff] }
  0x23   :  { %638 = vmatpush.bf16.msra.mxu0 %v1395_v21  ;;  %1459 = vmatpush.bf16.msra.mxu3 %v1395_v21  ;;  %v177_v21 = vpack.c.bf16 %v93_v16, %v86_v15  ;;  %v127_v56 = vld [vmem:[%s2160_s0 + $0x2a8] sm:$0xff]  ;;  %v45_v57 = vld [vmem:[%s2160_s0 + $0x18] sm:$0xff]  ;;  %v52_v58 = vld [vmem:[%s2160_s0 + $0x50] sm:$0xff] }
  0x24   :  { %687 = vmatpush.bf16.msra.mxu1 %v1403_v22  ;;  %v1422_v22 = vld [vmem:[#allocation3 + $0xd8] sm:$0xff]  ;;  %v102_v59 = vld [vmem:[%s2160_s0 + $0x1e0] sm:$0xff]  ;;  %v128_v62 = vld [vmem:[%s2160_s0 + $0x2b0] sm:$0xff] }
  0x25   :  { %736 = vmatpush.bf16.msra.mxu2 %v1411_v23  ;;  %v1441_v23 = vld [vmem:[#allocation3 + $0x170] sm:$0xff]  ;;  %v109_v60 = vld [vmem:[%s2160_s0 + $0x218] sm:$0xff]  ;;  %v134_v61 = vld [vmem:[%s2160_s0 + $0x2e0] sm:$0xff] }
  0x26   :  { %639 = vmatmul.bf16.vlgmr.msra.gmra.mxu0 %v154_v33  ;;  %649 = vmatmul.bf16.vlgmr.msra.gmra.mxu3 %v168_v34  ;;  %v107_v33 = vld [vmem:[%s2160_s0 + $0x208] sm:$0xff]  ;;  %v1419_v34 = vld [vmem:[#allocation3 + $0xc0] sm:$0xff]  ;;  %v148_v10 = vld [vmem:[%s2160_s0 + $0x350] sm:$0xff] }
  0x27   :  { %827 = vmatpush.bf16.msrb.mxu0 %v1434_v32  ;;  %688 = vmatmul.bf16.vlgmr.msra.gmra.mxu1 %v155_v35  ;;  %v100_v32 = vld [vmem:[%s2160_s0 + $0x1d0] sm:$0xff]  ;;  %v196_v35 = vpack.c.bf16 %v133_v27, %v126_v26  ;;  %v135_v63 = vld [vmem:[%s2160_s0 + $0x2e8] sm:$0xff]  ;;  %v142_v11 = vld [vmem:[%s2160_s0 + $0x320] sm:$0xff] }
  0x28   :  { %737 = vmatmul.bf16.vlgmr.msra.gmra.mxu2 %v156_v36  ;;  %778 = vmatpush.bf16.msra.mxu3 %v1426_v4  ;;  %v172_v36 = vpack.c.bf16 %v81_v31, %v74_v30  ;;  %v198_v4 = vpack.c.bf16 %v135_v63, %v128_v62  ;;  %v123_v9 = vld [vmem:[%s2160_s0 + $0x288] sm:$0xff]  ;;  %v149_v12 = vld [vmem:[%s2160_s0 + $0x358] sm:$0xff] }
  0x29   :  { %1468 = vmatpush.bf16.msrb.mxu2 %v1662_v5  ;;  %1460 = vmatpush.bf16.msrb.mxu1 %v1442_v6  ;;  %v205_v16 = vpack.c.bf16 %v149_v12, %v142_v11 }
  0x2b   :  { %828 = vmatpush.bf16.msrb.mxu0 %v1433_v37  ;;  %v183_v37 = vpack.c.bf16 %v106_v29, %v99_v28 }
  0x2c   :  { %779 = vmatpush.bf16.msra.mxu3 %v1425_v7  ;;  %v59_v7 = vld [vmem:[%s2160_s0 + $0x88] sm:$0xff] }
  0x2d   :  { %1461 = vmatpush.bf16.msrb.mxu1 %v1441_v23 }
  0x2f   :  { %829 = vmatpush.bf16.msrb.mxu0 %v1432_v38  ;;  %v184_v38 = vpack.c.bf16 %v107_v33, %v100_v32 }
  0x30   :  { %780 = vmatpush.bf16.msra.mxu3 %v1424_v8  ;;  %v66_v8 = vld [vmem:[%s2160_s0 + $0xc0] sm:$0xff] }
  0x31   :  { %v164_v13 = vpack.c.bf16 %v66_v8, %v59_v7  ;;  %v54_v7 = vld [vmem:[%s2160_s0 + $0x60] sm:$0xff]  ;;  %v89_v8 = vld [vmem:[%s2160_s0 + $0x178] sm:$0xff] }
  0x33   :  { %830 = vmatpush.bf16.msrb.mxu0 %v1431_v39  ;;  %v1440_v39 = vld [vmem:[#allocation3 + $0x168] sm:$0xff] }
  0x34   :  { %781 = vmatpush.bf16.msra.mxu3 %v1423_v17  ;;  %1462 = vmatpush.bf16.msrb.mxu1 %v1440_v39  ;;  %v1789_v17 = vld [vmem:[%s2162_s2] ss:$0 sm:$0xff] }
  0x36   :  { %644 = vmatmul.bf16.gmra.mxu0 %v161_v49  ;;  %654 = vmatmul.bf16.gmra.mxu3 %v175_v50  ;;  %v203_v49 = vpack.c.bf16 %v147_v42, %v140_v41  ;;  %v179_v50 = vpack.c.bf16 %v95_v45, %v88_v44  ;;  %v87_v41 = vld [vmem:[%s2160_s0 + $0x168] sm:$0xff]  ;;  %v94_v42 = vld [vmem:[%s2160_s0 + $0x1a0] sm:$0xff] }
  0x37   :  { %831 = vmatpush.bf16.msrb.mxu0 %v1430_v48  ;;  %693 = vmatmul.bf16.gmra.mxu1 %v162_v51  ;;  %v121_v48 = vld [vmem:[%s2160_s0 + $0x278] sm:$0xff]  ;;  %v190_v51 = vpack.c.bf16 %v120_v46, %v113_v43  ;;  %v144_v43 = vld [vmem:[%s2160_s0 + $0x330] sm:$0xff]  ;;  %v151_v44 = vld [vmem:[%s2160_s0 + $0x368] sm:$0xff] }
  0x38   :  { %742 = vmatmul.bf16.gmra.mxu2 %v163_v52  ;;  %782 = vmatpush.bf16.msra.mxu3 %v1422_v22  ;;  %v191_v52 = vpack.c.bf16 %v121_v48, %v114_v47  ;;  %v61_v22 = vld [vmem:[%s2160_s0 + $0x98] sm:$0xff]  ;;  %v75_v45 = vld [vmem:[%s2160_s0 + $0x108] sm:$0xff]  ;;  %v82_v46 = vld [vmem:[%s2160_s0 + $0x140] sm:$0xff] }
  0x39   :  { %1463 = vmatpush.bf16.msrb.mxu1 %v1439_v40  ;;  %v76_v47 = vld [vmem:[%s2160_s0 + $0x110] sm:$0xff]  ;;  %v83_v48 = vld [vmem:[%s2160_s0 + $0x148] sm:$0xff] }
  0x3b   :  { %832 = vmatpush.bf16.msrb.mxu0 %v1429_v53  ;;  %v1438_v53 = vld [vmem:[#allocation3 + $0x158] sm:$0xff] }
  0x3c   :  { %783 = vmatpush.bf16.msra.mxu3 %v1421_v24  ;;  %v62_v24 = vld [vmem:[%s2160_s0 + $0xa0] sm:$0xff] }
  0x3d   :  { %1464 = vmatpush.bf16.msrb.mxu1 %v1438_v53 }
  0x3f   :  { %833 = vmatpush.bf16.msrb.mxu0 %v1428_v54  ;;  %v1437_v54 = vld [vmem:[#allocation3 + $0x150] sm:$0xff] }
  0x40   :  { %784 = vmatpush.bf16.msra.mxu3 %v1420_v25  ;;  %v69_v25 = vld [vmem:[%s2160_s0 + $0xd8] sm:$0xff] }
  0x41   :  { %1465 = vmatpush.bf16.msrb.mxu1 %v1437_v54  ;;  %v167_v30 = vpack.c.bf16 %v69_v25, %v62_v24 }
  0x43   :  { %834 = vmatpush.bf16.msrb.mxu0 %v1427_v55  ;;  %v1436_v55 = vld [vmem:[#allocation3 + $0x148] sm:$0xff] }
  0x44   :  { %785 = vmatpush.bf16.msra.mxu3 %v1419_v34 }
  0x45   :  { %1466 = vmatpush.bf16.msrb.mxu1 %v1436_v55 }
  0x46   :  { %659 = vmatmul.bf16.gmra.mxu3 %v182_v0  ;;  %835 = vmatmul.bf16.vlgmr.msrb.gmra.mxu0 %v158_v1  ;;  %v157_v0 = vpack.c.bf16 %v52_v58, %v45_v57  ;;  %v186_v1 = vpack.c.bf16 %v109_v60, %v102_v59 }
  0x47   :  { %698 = vmatmul.bf16.gmra.mxu1 %v169_v2  ;;  %876 = vmatpush.bf16.msra.mxu0 %v1442_v6  ;;  %v1435_v2 = vld [vmem:[#allocation3 + $0x140] sm:$0xff]  ;;  %v141_v6 = vld [vmem:[%s2160_s0 + $0x318] sm:$0xff] }
  0x48   :  { %747 = vmatmul.bf16.gmra.mxu2 %v170_v3  ;;  %v197_v3 = vpack.c.bf16 %v134_v61, %v127_v56  ;;  %v204_v15 = vpack.c.bf16 %v148_v10, %v141_v6  ;;  %v174_v56 = vpack.c.bf16 %v83_v48, %v76_v47  ;;  %v47_v6 = vld [vmem:[%s2160_s0 + $0x28] sm:$0xff]  ;;  %v97_v10 = vld [vmem:[%s2160_s0 + $0x1b8] sm:$0xff] }
  0x49   :  { %1467 = vmatpush.bf16.msrb.mxu1 %v1435_v2 }
  0x4b   :  { %877 = vmatpush.bf16.msra.mxu0 %v1441_v23  ;;  %v68_v23 = vld [vmem:[%s2160_s0 + $0xd0] sm:$0xff] }
  0x4c   :  { %v166_v29 = vpack.c.bf16 %v68_v23, %v61_v22 }
  0x4f   :  { %878 = vmatpush.bf16.msra.mxu0 %v1440_v39 }
  0x53   :  { %879 = vmatpush.bf16.msra.mxu0 %v1439_v40 }
  0x56   :  { %664 = vmatmul.bf16.gmra.mxu3 %v189_v18  ;;  %840 = vmatmul.bf16.gmra.mxu0 %v165_v19  ;;  %v73_v18 = vld [vmem:[%s2160_s0 + $0xf8] sm:$0xff]  ;;  %v80_v19 = vld [vmem:[%s2160_s0 + $0x130] sm:$0xff] }
  0x57   :  { %703 = vmatmul.bf16.gmra.mxu1 %v176_v20  ;;  %880 = vmatpush.bf16.msra.mxu0 %v1438_v53  ;;  %v130_v20 = vld [vmem:[%s2160_s0 + $0x2c0] sm:$0xff]  ;;  %v171_v26 = vpack.c.bf16 %v80_v19, %v73_v18 }
  0x58   :  { %752 = vmatmul.bf16.gmra.mxu2 %v177_v21  ;;  %v137_v21 = vld [vmem:[%s2160_s0 + $0x2f8] sm:$0xff] }
  0x59   :  { %v200_v27 = vpack.c.bf16 %v137_v21, %v130_v20 }
  0x5b   :  { %881 = vmatpush.bf16.msra.mxu0 %v1437_v54 }
  0x5f   :  { %882 = vmatpush.bf16.msra.mxu0 %v1436_v55  ;;  %v173_v55 = vpack.c.bf16 %v82_v46, %v75_v45 }
  0x63   :  { %883 = vmatpush.bf16.msra.mxu0 %v1435_v2 }
  0x66   :  { %669 = vmatmul.bf16.gmra.mxu3 %v196_v35  ;;  %845 = vmatmul.bf16.gmra.mxu0 %v172_v36 }
  0x67   :  { %708 = vmatmul.bf16.gmra.mxu1 %v183_v37  ;;  %932 = vmatpush.bf16.msrb.mxu0 %v1662_v5  ;;  %v116_v5 = vld [vmem:[%s2160_s0 + $0x250] sm:$0xff] }
  0x68   :  { %757 = vmatmul.bf16.gmra.mxu2 %v184_v38  ;;  %v193_v14 = vpack.c.bf16 %v123_v9, %v116_v5  ;;  %v96_v5 = vld [vmem:[%s2160_s0 + $0x1b0] sm:$0xff]  ;;  %v90_v9 = vld [vmem:[%s2160_s0 + $0x180] sm:$0xff] }
  0x69   :  { %v180_v19 = vpack.c.bf16 %v96_v5, %v89_v8  ;;  %v181_v20 = vpack.c.bf16 %v97_v10, %v90_v9 }
  0x76   :  { %674 = vmatmul.bf16.gmra.mxu3 %v203_v49  ;;  %850 = vmatmul.bf16.gmra.mxu0 %v179_v50 }
  0x77   :  { %713 = vmatmul.bf16.gmra.mxu1 %v190_v51  ;;  %v178_v51 = vpack.c.bf16 %v94_v42, %v87_v41 }
  0x78   :  { %762 = vmatmul.bf16.gmra.mxu2 %v191_v52  ;;  %v207_v52 = vpack.c.bf16 %v151_v44, %v144_v43 }
  0x86   :  { %786 = vmatmul.bf16.vlgmr.msra.gmra.mxu3 %v157_v0  ;;  %855 = vmatmul.bf16.gmra.mxu0 %v186_v1 }
  0x87   :  { %718 = vmatmul.bf16.gmra.mxu1 %v197_v3  ;;  %v101_v3 = vld [vmem:[%s2160_s0 + $0x1d8] sm:$0xff] }
  0x88   :  { %767 = vmatmul.bf16.gmra.mxu2 %v198_v4  ;;  %v108_v4 = vld [vmem:[%s2160_s0 + $0x210] sm:$0xff] }
  0x96   :  { %791 = vmatmul.bf16.gmra.mxu3 %v164_v13  ;;  %860 = vmatmul.bf16.gmra.mxu0 %v193_v14  ;;  %v185_v13 = vpack.c.bf16 %v108_v4, %v101_v3  ;;  %v159_v14 = vpack.c.bf16 %v54_v7, %v47_v6 }
  0x97   :  { %723 = vmatmul.bf16.gmra.mxu1 %v204_v15 }
  0x98   :  { %772 = vmatmul.bf16.gmra.mxu2 %v205_v16 }
  0xa3   :  { %v640_v28 = vpop.f32.mrf.mxu0 }
  0xa4   :  { %v641_v31 = vadd.f32 %v1789_v17, %v640_v28  ;;  %v689_v32 = vpop.f32.mrf.mxu1 }
  0xa6   :  { %v690_v33 = vadd.f32 %v689_v32, %v641_v31  ;;  %796 = vmatmul.bf16.gmra.mxu3 %v171_v26  ;;  %865 = vmatmul.bf16.gmra.mxu0 %v200_v27  ;;  %v122_v31 = vld [vmem:[%s2160_s0 + $0x280] sm:$0xff]  ;;  %v103_v32 = vld [vmem:[%s2160_s0 + $0x1e8] sm:$0xff] }
  0xa7   :  { %889 = vmatmul.bf16.vlgmr.msrb.gmra.mxu1 %v166_v29 }
  0xa8   :  { %1356 = vmatmul.msk.bf16.vlgmr.msrb.gmra.mxu2 %vm606_vm0, %v167_v30  ;;  %v115_v30 = vld [vmem:[%s2160_s0 + $0x248] sm:$0xff] }
  0xa9   :  { %v650_v34 = vpop.f32.mrf.mxu3  ;;  %v192_v41 = vpack.c.bf16 %v122_v31, %v115_v30 }
  0xaa   :  { %v651_v15 = vadd.f32 %v1789_v17, %v650_v34  ;;  %v55_v34 = vld [vmem:[%s2160_s0 + $0x68] sm:$0xff] }
  0xab   :  { %v738_v35 = vpop.f32.mrf.mxu2  ;;  %v642_v37 = vpop.f32.mrf.mxu0 }
  0xac   :  { %v1817_v36 = vadd.f32 %v738_v35, %v690_v33  ;;  %v643_v38 = vadd.f32 %v1789_v17, %v642_v37  ;;  %v691_v39 = vpop.f32.mrf.mxu1  ;;  %v48_v33 = vld [vmem:[%s2160_s0 + $0x30] sm:$0xff]  ;;  %v110_v35 = vld [vmem:[%s2160_s0 + $0x220] sm:$0xff] }
  0xad   :  { %v104_v37 = vld [vmem:[%s2160_s0 + $0x1f0] sm:$0xff]  ;;  %v160_v42 = vpack.c.bf16 %v55_v34, %v48_v33  ;;  %v187_v46 = vpack.c.bf16 %v110_v35, %v103_v32 }
  0xae   :  { %v692_v40 = vadd.f32 %v691_v39, %v643_v38  ;;  %v111_v38 = vld [vmem:[%s2160_s0 + $0x228] sm:$0xff] }
  0xaf   :  { %v188_v47 = vpack.c.bf16 %v111_v38, %v104_v37 }
  0xb1   :  { %v652_v49 = vpop.f32.mrf.mxu3 }
  0xb2   :  { %v653_v25 = vadd.f32 %v1789_v17, %v652_v49 }
  0xb3   :  { %v740_v50 = vpop.f32.mrf.mxu2  ;;  %v645_v54 = vpop.f32.mrf.mxu0 }
  0xb4   :  { %v1844_v53 = vadd.f32 %v740_v50, %v692_v40  ;;  %v646_v57 = vadd.f32 %v1789_v17, %v645_v54  ;;  %v694_v58 = vpop.f32.mrf.mxu1 }
  0xb6   :  { %v695_v59 = vadd.f32 %v694_v58, %v646_v57  ;;  %801 = vmatmul.bf16.gmra.mxu3 %v178_v51  ;;  %870 = vmatmul.bf16.gmra.mxu0 %v207_v52  ;;  %v129_v58 = vld [vmem:[%s2160_s0 + $0x2b8] sm:$0xff] }
  0xb7   :  { %894 = vmatmul.bf16.gmra.mxu1 %v173_v55 }
  0xb8   :  { %1357 = vmatmul.msk.bf16.gmra.mxu2 %vm606_vm0, %v174_v56 }
  0xb9   :  { %v655_v60 = vpop.f32.mrf.mxu3 }
  0xba   :  { %v656_v43 = vadd.f32 %v1789_v17, %v655_v60  ;;  %v117_v60 = vld [vmem:[%s2160_s0 + $0x258] sm:$0xff] }
  0xbb   :  { %v743_v61 = vpop.f32.mrf.mxu2  ;;  %v647_v63 = vpop.f32.mrf.mxu0 }
  0xbc   :  { %v1848_v62 = vadd.f32 %v743_v61, %v695_v59  ;;  %v648_v0 = vadd.f32 %v1789_v17, %v647_v63  ;;  %v696_v1 = vpop.f32.mrf.mxu1  ;;  %v136_v59 = vld [vmem:[%s2160_s0 + $0x2f0] sm:$0xff]  ;;  %v118_v63 = vld [vmem:[%s2160_s0 + $0x260] sm:$0xff] }
  0xbd   :  { %v124_v61 = vld [vmem:[%s2160_s0 + $0x290] sm:$0xff]  ;;  %v199_v3 = vpack.c.bf16 %v136_v59, %v129_v58 }
  0xbe   :  { %v697_v2 = vadd.f32 %v696_v1, %v648_v0  ;;  %v125_v0 = vld [vmem:[%s2160_s0 + $0x298] sm:$0xff]  ;;  %v194_v7 = vpack.c.bf16 %v124_v61, %v117_v60 }
  0xbf   :  { %v195_v8 = vpack.c.bf16 %v125_v0, %v118_v63 }
  0xc1   :  { %v657_v11 = vpop.f32.mrf.mxu3 }
  0xc2   :  { %v658_v52 = vadd.f32 %v1789_v17, %v657_v11 }
  0xc3   :  { %v745_v12 = vpop.f32.mrf.mxu2  ;;  %v1878_v18 = vpop.f32.mrf.mxu0 }
  0xc4   :  { %v1876_v16 = vadd.f32 %v745_v12, %v697_v2  ;;  %v699_v21 = vpop.f32.mrf.mxu1 }
  0xc5   :  { %v700_v22 = vadd.f32 %v699_v21, %v651_v15  ;;  %v150_v21 = vld [vmem:[%s2160_s0 + $0x360] sm:$0xff] }
  0xc6   :  { %806 = vmatmul.bf16.gmra.mxu3 %v185_v13  ;;  %884 = vmatmul.bf16.vlgmr.msra.gmra.mxu0 %v159_v14 }
  0xc7   :  { %899 = vmatmul.bf16.gmra.mxu1 %v180_v19 }
  0xc8   :  { %1358 = vmatmul.msk.bf16.gmra.mxu2 %vm606_vm0, %v181_v20  ;;  %v143_v20 = vld [vmem:[%s2160_s0 + $0x328] sm:$0xff] }
  0xc9   :  { %v660_v23 = vpop.f32.mrf.mxu3  ;;  %v206_v31 = vpack.c.bf16 %v150_v21, %v143_v20 }
  0xca   :  { %v661_v9 = vadd.f32 %v1789_v17, %v660_v23  ;;  %v138_v23 = vld [vmem:[%s2160_s0 + $0x300] sm:$0xff] }
  0xcb   :  { %v748_v24 = vpop.f32.mrf.mxu2  ;;  %v1884_v27 = vpop.f32.mrf.mxu0 }
  0xcc   :  { %v1882_v26 = vadd.f32 %v748_v24, %v700_v22  ;;  %v701_v28 = vpop.f32.mrf.mxu1  ;;  %v131_v22 = vld [vmem:[%s2160_s0 + $0x2c8] sm:$0xff]  ;;  %v132_v24 = vld [vmem:[%s2160_s0 + $0x2d0] sm:$0xff] }
  0xcd   :  { %v702_v29 = vadd.f32 %v701_v28, %v653_v25  ;;  %v139_v25 = vld [vmem:[%s2160_s0 + $0x308] sm:$0xff]  ;;  %v201_v35 = vpack.c.bf16 %v138_v23, %v131_v22 }
  0xce   :  { %v202_v37 = vpack.c.bf16 %v139_v25, %v132_v24 }
  0xd1   :  { %v662_v39 = vpop.f32.mrf.mxu3 }
  0xd2   :  { %v663_v19 = vadd.f32 %v1789_v17, %v662_v39 }
  0xd3   :  { %v750_v40 = vpop.f32.mrf.mxu2  ;;  %v1913_v45 = vpop.f32.mrf.mxu0 }
  0xd4   :  { %v1911_v44 = vadd.f32 %v750_v40, %v702_v29  ;;  %v704_v48 = vpop.f32.mrf.mxu1 }
  0xd5   :  { %v705_v49 = vadd.f32 %v704_v48, %v656_v43 }
  0xd6   :  { %811 = vmatmul.bf16.gmra.mxu3 %v192_v41  ;;  %1355 = vmatmul.msk.bf16.vlgmr.msrb.gmra.mxu0 %vm606_vm0, %v160_v42 }
  0xd7   :  { %904 = vmatmul.bf16.gmra.mxu1 %v187_v46 }
  0xd8   :  { %1359 = vmatmul.msk.bf16.gmra.mxu2 %vm606_vm0, %v188_v47 }
  0xd9   :  { %v665_v50 = vpop.f32.mrf.mxu3 }
  0xda   :  { %v666_v32 = vadd.f32 %v1789_v17, %v665_v50  ;;  %v152_v50 = vld [vmem:[%s2160_s0 + $0x370] sm:$0xff] }
  0xdb   :  { %v753_v51 = vpop.f32.mrf.mxu2  ;;  %v1920_v55 = vpop.f32.mrf.mxu0 }
  0xdc   :  { %v1918_v54 = vadd.f32 %v753_v51, %v705_v49  ;;  %v706_v56 = vpop.f32.mrf.mxu1  ;;  %v145_v49 = vld [vmem:[%s2160_s0 + $0x338] sm:$0xff]  ;;  %v146_v51 = vld [vmem:[%s2160_s0 + $0x340] sm:$0xff] }
  0xdd   :  { %v707_v57 = vadd.f32 %v706_v56, %v658_v52  ;;  %v153_v52 = vld [vmem:[%s2160_s0 + $0x378] sm:$0xff]  ;;  %v208_v61 = vpack.c.bf16 %v152_v50, %v145_v49 }
  0xde   :  { %v209_v63 = vpack.c.bf16 %v153_v52, %v146_v51 }
  0xe1   :  { %v667_v1 = vpop.f32.mrf.mxu3 }
  0xe2   :  { %v668_v42 = vadd.f32 %v1789_v17, %v667_v1 }
  0xe3   :  { %v755_v2 = vpop.f32.mrf.mxu2  ;;  %v1942_v6 = vpop.f32.mrf.mxu0 }
  0xe4   :  { %v1940_v4 = vadd.f32 %v755_v2, %v707_v57  ;;  %v709_v5 = vpop.f32.mrf.mxu1 }
  0xe5   :  { %v710_v10 = vadd.f32 %v709_v5, %v661_v9 }
  0xe6   :  { %816 = vmatmul.bf16.gmra.mxu3 %v199_v3 }
  0xe7   :  { %909 = vmatmul.bf16.gmra.mxu1 %v194_v7 }
  0xe8   :  { %1360 = vmatmul.msk.bf16.gmra.mxu2 %vm606_vm0, %v195_v8 }
  0xe9   :  { %v670_v11 = vpop.f32.mrf.mxu3 }
  0xea   :  { %v671_v58 = vadd.f32 %v1789_v17, %v670_v11 }
  0xeb   :  { %v758_v12 = vpop.f32.mrf.mxu2  ;;  %v1948_v14 = vpop.f32.mrf.mxu0 }
  0xec   :  { %v1946_v13 = vadd.f32 %v758_v12, %v710_v10  ;;  %v711_v15 = vpop.f32.mrf.mxu1 }
  0xed   :  { %v712_v28 = vadd.f32 %v711_v15, %v663_v19 }
  0xf1   :  { %v672_v29 = vpop.f32.mrf.mxu3 }
  0xf2   :  { %v673_v8 = vadd.f32 %v1789_v17, %v672_v29 }
  0xf3   :  { %v760_v30 = vpop.f32.mrf.mxu2  ;;  %v1972_v34 = vpop.f32.mrf.mxu0 }
  0xf4   :  { %v1970_v33 = vadd.f32 %v760_v30, %v712_v28  ;;  %v714_v38 = vpop.f32.mrf.mxu1 }
  0xf5   :  { %v715_v39 = vadd.f32 %v714_v38, %v666_v32 }
  0xf6   :  { %821 = vmatmul.bf16.gmra.mxu3 %v206_v31 }
  0xf7   :  { %914 = vmatmul.bf16.gmra.mxu1 %v201_v35 }
  0xf8   :  { %1361 = vmatmul.msk.bf16.gmra.mxu2 %vm606_vm0, %v202_v37 }
  0xf9   :  { %v675_v40 = vpop.f32.mrf.mxu3 }
  0xfa   :  { %v676_v20 = vadd.f32 %v1789_v17, %v675_v40 }
  0xfb   :  { %v763_v41 = vpop.f32.mrf.mxu2  ;;  %v1978_v46 = vpop.f32.mrf.mxu0 }
  0xfc   :  { %v1976_v43 = vadd.f32 %v763_v41, %v715_v39  ;;  %v716_v47 = vpop.f32.mrf.mxu1 }
  0xfd   :  { %v717_v48 = vadd.f32 %v716_v47, %v668_v42 }
 0x101   :  { %v677_v56 = vpop.f32.mrf.mxu3 }
 0x102   :  { %v678_v29 = vadd.f32 %v1789_v17, %v677_v56 }
 0x103   :  { %v765_v57 = vpop.f32.mrf.mxu2  ;;  %v1995_v60 = vpop.f32.mrf.mxu0 }
 0x104   :  { %v1993_v59 = vadd.f32 %v765_v57, %v717_v48  ;;  %v719_v0 = vpop.f32.mrf.mxu1 }
 0x105   :  { %v720_v1 = vadd.f32 %v719_v0, %v671_v58 }
 0x107   :  { %919 = vmatmul.bf16.gmra.mxu1 %v208_v61 }
 0x108   :  { %1362 = vmatmul.msk.bf16.gmra.mxu2 %vm606_vm0, %v209_v63 }
 0x109   :  { %v787_v2 = vpop.f32.mrf.mxu3 }
 0x10a   :  { %v1999_v7 = vadd.f32 %v787_v2, %v1817_v36 }
 0x10b   :  { %v768_v3 = vpop.f32.mrf.mxu2  ;;  %v2004_v9 = vpop.f32.mrf.mxu0 }
 0x10c   :  { %v2002_v5 = vadd.f32 %v768_v3, %v720_v1  ;;  %v721_v10 = vpop.f32.mrf.mxu1 }
 0x10d   :  { %v722_v11 = vadd.f32 %v721_v10, %v673_v8 }
 0x111   :  { %v789_v12 = vpop.f32.mrf.mxu3 }
 0x112   :  { %v2007_v19 = vadd.f32 %v789_v12, %v1844_v53 }
 0x113   :  { %v770_v15 = vpop.f32.mrf.mxu2  ;;  %v2012_v22 = vpop.f32.mrf.mxu0 }
 0x114   :  { %v2010_v21 = vadd.f32 %v770_v15, %v722_v11  ;;  %v724_v36 = vpop.f32.mrf.mxu1 }
 0x115   :  { %v725_v23 = vadd.f32 %v724_v36, %v676_v20 }
 0x119   :  { %v792_v24 = vpop.f32.mrf.mxu3 }
 0x11a   :  { %v793_v28 = vadd.f32 %v792_v24, %v1848_v62 }
 0x11b   :  { %v773_v25 = vpop.f32.mrf.mxu2  ;;  %v2018_v31 = vpop.f32.mrf.mxu0 }
 0x11c   :  { %v2016_v30 = vadd.f32 %v773_v25, %v725_v23  ;;  %v726_v53 = vpop.f32.mrf.mxu1  ;;  %v842_v41 = vadd.f32 %v1913_v45, %v793_v28 }
 0x11d   :  { %v727_v32 = vadd.f32 %v726_v53, %v678_v29 }
 0x121   :  { %v794_v35 = vpop.f32.mrf.mxu3 }
 0x122   :  { %v795_v38 = vadd.f32 %v794_v35, %v1876_v16  ;;  %v2033_v16 = vstv %s2163_s3 }
 0x123   :  { %v775_v37 = vpop.f32.mrf.mxu2  ;;  %v2023_v40 = vpop.f32.mrf.mxu0 }
 0x124   :  { %v2021_v39 = vadd.f32 %v775_v37, %v727_v32  ;;  %v890_v42 = vpop.f32.mrf.mxu1  ;;  %v844_v51 = vadd.f32 %v1920_v55, %v795_v38 }
 0x125   :  { %v891_v62 = vadd.f32 %v890_v42, %v842_v41 }
 0x129   :  { %v797_v47 = vpop.f32.mrf.mxu3 }
 0x12a   :  { %v798_v17 = vadd.f32 %v797_v47, %v1882_v26 }
 0x12b   :  { %v939_v48 = vpop.f32.mrf.mxu2  ;;  %v2027_v50 = vpop.f32.mrf.mxu0 }
 0x12c   :  { %v940_v49 = vadd.f32 %v939_v48, %v891_v62  ;;  %v892_v52 = vpop.f32.mrf.mxu1  ;;  %v847_v0 = vadd.f32 %v1942_v6, %v798_v17 }
 0x12d   :  { %v893_v56 = vadd.f32 %v892_v52, %v844_v51 }
 0x12e   :  { %v994_v61 = vmul.f32 %v2033_v16, %v940_v49  ;;  %vm977_vm1 = vcmp.gt.f32.partialorder %v940_v49, 0.0 }
 0x130   :  { %v2041_v3 = vsel %vm977_vm1, %v940_v49, %v994_v61 }
 0x131   :  { %v799_v57 = vpop.f32.mrf.mxu3 }
 0x132   :  { %v800_v45 = vadd.f32 %v799_v57, %v1911_v44 }
 0x133   :  { %v941_v58 = vpop.f32.mrf.mxu2  ;;  %v2037_v63 = vpop.f32.mrf.mxu0 }
 0x134   :  { %v942_v26 = vadd.f32 %v941_v58, %v893_v56  ;;  %v895_v55 = vpop.f32.mrf.mxu1  ;;  %v849_v6 = vadd.f32 %v1948_v14, %v800_v45 }
 0x135   :  { %v896_v2 = vadd.f32 %v895_v55, %v847_v0 }
 0x136   :  { %vm978_vm2 = vcmp.gt.f32.partialorder %v942_v26, 0.0  ;;  %v995_v1 = vmul.f32 %v2033_v16, %v942_v26 }
 0x138   :  { %v2043_v8 = vsel %vm978_vm2, %v942_v26, %v995_v1 }
 0x139   :  { %v1041_v44 = vpack.c.bf16 %v2043_v8, %v2041_v3  ;;  %v802_v10 = vpop.f32.mrf.mxu3 }
 0x13a   :  { %v803_v11 = vadd.f32 %v802_v10, %v1918_v54  ;;  %v839_v10 = vadd.f32 %v1884_v27, %v2007_v19 }
 0x13b   :  { %v944_v12 = vpop.f32.mrf.mxu2  ;;  %v2048_v20 = vpop.f32.mrf.mxu0 }
 0x13c   :  { %v945_v15 = vadd.f32 %v944_v12, %v896_v2  ;;  %v897_v36 = vpop.f32.mrf.mxu1  ;;  %v852_v35 = vadd.f32 %v1972_v34, %v803_v11 }
 0x13d   :  { %v898_v23 = vadd.f32 %v897_v36, %v849_v6 }
 0x13e   :  { %v996_v29 = vmul.f32 %v2033_v16, %v945_v15  ;;  %vm979_vm3 = vcmp.gt.f32.partialorder %v945_v15, 0.0 }
 0x140   :  { %v2055_v41 = vsel %vm979_vm3, %v945_v15, %v996_v29 }
 0x141   :  { %v804_v24 = vpop.f32.mrf.mxu3 }
 0x142   :  { %v805_v25 = vadd.f32 %v804_v24, %v1940_v4 }
 0x143   :  { %v946_v28 = vpop.f32.mrf.mxu2  ;;  %v885_v32 = vpop.f32.mrf.mxu0 }
 0x144   :  { %v947_v53 = vadd.f32 %v946_v28, %v898_v23  ;;  %v900_v54 = vpop.f32.mrf.mxu1  ;;  %v854_v34 = vadd.f32 %v1978_v46, %v805_v25 }
 0x145   :  { %v901_v38 = vadd.f32 %v900_v54, %v852_v35 }
 0x146   :  { %vm980_vm4 = vcmp.gt.f32.partialorder %v947_v53, 0.0  ;;  %v997_v37 = vmul.f32 %v2033_v16, %v947_v53 }
 0x148   :  { %v2057_v14 = vsel %vm980_vm4, %v947_v53, %v997_v37 }
 0x149   :  { %v1042_v4 = vpack.c.bf16 %v2057_v14, %v2055_v41  ;;  %v807_v42 = vpop.f32.mrf.mxu3 }
 0x14a   :  { %v808_v62 = vadd.f32 %v807_v42, %v1946_v13  ;;  %v837_v13 = vadd.f32 %v1878_v18, %v1999_v7 }
 0x14b   :  { %v949_v47 = vpop.f32.mrf.mxu2  ;;  %v887_v48 = vpop.f32.mrf.mxu0 }
 0x14c   :  { %v950_v17 = vadd.f32 %v949_v47, %v901_v38  ;;  %v902_v49 = vpop.f32.mrf.mxu1  ;;  %v857_v61 = vadd.f32 %v1995_v60, %v808_v62  ;;  %v886_v1 = vadd.f32 %v885_v32, %v837_v13  ;;  %v888_v18 = vadd.f32 %v887_v48, %v839_v10 }
 0x14d   :  { %v903_v51 = vadd.f32 %v902_v49, %v854_v34 }
 0x14e   :  { %v998_v45 = vmul.f32 %v2033_v16, %v950_v17  ;;  %vm981_vm5 = vcmp.gt.f32.partialorder %v950_v17, 0.0 }
 0x150   :  { %v2069_v2 = vsel %vm981_vm5, %v950_v17, %v998_v45 }
 0x151   :  { %v809_v52 = vpop.f32.mrf.mxu3 }
 0x152   :  { %v810_v56 = vadd.f32 %v809_v52, %v1970_v33 }
 0x153   :  { %v951_v57 = vpop.f32.mrf.mxu2  ;;  %v934_v26 = vpop.f32.mrf.mxu0 }
 0x154   :  { %v952_v58 = vadd.f32 %v951_v57, %v903_v51  ;;  %v905_v0 = vpop.f32.mrf.mxu1  ;;  %v935_v11 = vadd.f32 %v934_v26, %v886_v1  ;;  %v859_v6 = vadd.f32 %v2004_v9, %v810_v56 }
 0x155   :  { %v906_v55 = vadd.f32 %v905_v0, %v857_v61 }
 0x156   :  { %vm982_vm6 = vcmp.gt.f32.partialorder %v952_v58, 0.0  ;;  %v999_v46 = vmul.f32 %v2033_v16, %v952_v58  ;;  %v992_v23 = vmul.f32 %v2033_v16, %v935_v11  ;;  %vm975_vm7 = vcmp.gt.f32.partialorder %v935_v11, 0.0 }
 0x158   :  { %v2071_v33 = vsel %vm982_vm6, %v952_v58, %v999_v46  ;;  %v2080_v19 = vsel %vm975_vm7, %v935_v11, %v992_v23  ;;  %v1449_v23 = vld [vmem:[%s2164_s4 + $0x28] sm:$0xff] }
 0x159   :  { %v1043_v60 = vpack.c.bf16 %v2071_v33, %v2069_v2  ;;  %v812_v12 = vpop.f32.mrf.mxu3 }
 0x15a   :  { %v813_v42 = vadd.f32 %v812_v12, %v1976_v43 }
 0x15b   :  { %v954_v7 = vpop.f32.mrf.mxu2  ;;  %v936_v36 = vpop.f32.mrf.mxu0 }
 0x15c   :  { %v955_v15 = vadd.f32 %v954_v7, %v906_v55  ;;  %v907_v24 = vpop.f32.mrf.mxu1  ;;  %v937_v25 = vadd.f32 %v936_v36, %v888_v18  ;;  %v862_v51 = vadd.f32 %v2012_v22, %v813_v42  ;;  %v1450_v7 = vld [vmem:[%s2164_s4 + $0x30] sm:$0xff] }
 0x15d   :  { %v908_v28 = vadd.f32 %v907_v24, %v859_v6 }
 0x15e   :  { %vm976_vm8 = vcmp.gt.f32.partialorder %v937_v25, 0.0  ;;  %v993_v27 = vmul.f32 %v2033_v16, %v937_v25  ;;  %v1000_v9 = vmul.f32 %v2033_v16, %v955_v15  ;;  %vm983_vm9 = vcmp.gt.f32.partialorder %v955_v15, 0.0 }
 0x160   :  { %v2082_v29 = vsel %vm976_vm8, %v937_v25, %v993_v27  ;;  %v2089_v62 = vsel %vm983_vm9, %v955_v15, %v1000_v9  ;;  %v1448_v27 = vld [vmem:[%s2164_s4 + $0x20] sm:$0xff] }
 0x161   :  { %v814_v53 = vpop.f32.mrf.mxu3  ;;  %v1040_v32 = vpack.c.bf16 %v2082_v29, %v2080_v19 }
 0x162   :  { %v815_v49 = vadd.f32 %v814_v53, %v1993_v59 }
 0x163   :  { %v956_v35 = vpop.f32.mrf.mxu2 }
 0x164   :  { %v957_v54 = vadd.f32 %v956_v35, %v908_v28  ;;  %v910_v37 = vpop.f32.mrf.mxu1  ;;  %v864_v45 = vadd.f32 %v2018_v31, %v815_v49  ;;  %v1451_v31 = vld [vmem:[%s2164_s4 + $0x38] sm:$0xff]  ;;  %v1446_v49 = vld [vmem:[%s2164_s4 + $0x10] sm:$0xff] }
 0x165   :  { %v911_v56 = vadd.f32 %v910_v37, %v862_v51  ;;  %1472 = vmatpush.lsf.bf16.msrb.mxu3 %v1451_v31 }
 0x166   :  { %vm984_vm10 = vcmp.gt.f32.partialorder %v957_v54, 0.0  ;;  %v1001_v38 = vmul.f32 %v2033_v16, %v957_v54 }
 0x168   :  { %v2091_v47 = vsel %vm984_vm10, %v957_v54, %v1001_v38  ;;  %v1447_v38 = vld [vmem:[%s2164_s4 + $0x18] sm:$0xff] }
 0x169   :  { %v1044_v17 = vpack.c.bf16 %v2091_v47, %v2089_v62  ;;  %v817_v48 = vpop.f32.mrf.mxu3  ;;  %1473 = vmatpush.lsf.bf16.msrb.mxu3 %v1450_v7  ;;  %v1049_v62 = vld [vmem:[%s2165_s5 + $0x8] sm:$0xff] }
 0x16a   :  { %v818_v59 = vadd.f32 %v817_v48, %v2002_v5 }
 0x16b   :  { %v959_v34 = vpop.f32.mrf.mxu2 }
 0x16c   :  { %v912_v52 = vpop.f32.mrf.mxu1  ;;  %v960_v57 = vadd.f32 %v959_v34, %v911_v56  ;;  %v867_v12 = vadd.f32 %v2023_v40, %v818_v59 }
 0x16d   :  { %v913_v58 = vadd.f32 %v912_v52, %v864_v45  ;;  %1474 = vmatpush.lsf.bf16.msrb.mxu3 %v1449_v23 }
 0x16e   :  { %v1002_v61 = vmul.f32 %v2033_v16, %v960_v57  ;;  %vm985_vm11 = vcmp.gt.f32.partialorder %v960_v57, 0.0 }
 0x170   :  { %v1018_v55 = vsel %vm985_vm11, %v960_v57, %v1002_v61  ;;  %v1445_v57 = vld [vmem:[%s2164_s4 + $0x8] sm:$0xff] }
 0x171   :  { %v819_v13 = vpop.f32.mrf.mxu3  ;;  %1475 = vmatpush.lsf.bf16.msrb.mxu3 %v1448_v27 }
 0x172   :  { %v820_v11 = vadd.f32 %v819_v13, %v2010_v21 }
 0x173   :  { %v961_v43 = vpop.f32.mrf.mxu2 }
 0x174   :  { %v962_v26 = vadd.f32 %v961_v43, %v913_v58  ;;  %v915_v0 = vpop.f32.mrf.mxu1  ;;  %v869_v36 = vadd.f32 %v2027_v50, %v820_v11  ;;  %v1444_v43 = vld [vmem:[%s2164_s4] sm:$0xff] }
 0x175   :  { %v916_v15 = vadd.f32 %v915_v0, %v867_v12  ;;  %1476 = vmatpush.lsf.bf16.msrb.mxu3 %v1447_v38  ;;  %v1547_v0 = vmov 0  }
 0x176   :  { %vm986_vm12 = vcmp.gt.f32.partialorder %v962_v26, 0.0  ;;  %v1003_v46 = vmul.f32 %v2033_v16, %v962_v26  ;;  %1490 = vset.pattern.permute.xlu0 %v1547_v0 }
 0x178   :  { %v1019_v22 = vsel %vm986_vm12, %v962_v26, %v1003_v46 }
 0x179   :  { %v1045_v1 = vpack.c.bf16 %v1019_v22, %v1018_v55  ;;  %v822_v5 = vpop.f32.mrf.mxu3  ;;  %1477 = vmatpush.lsf.bf16.msrb.mxu3 %v1446_v49 }
 0x17a   :  { %v823_v50 = vadd.f32 %v822_v5, %v2016_v30 }
 0x17b   :  { %v964_v10 = vpop.f32.mrf.mxu2 }
 0x17c   :  { %v917_v18 = vpop.f32.mrf.mxu1  ;;  %v965_v6 = vadd.f32 %v964_v10, %v916_v15  ;;  %v872_v34 = vadd.f32 %v2037_v63, %v823_v50 }
 0x17d   :  { %v918_v24 = vadd.f32 %v917_v18, %v869_v36  ;;  %1478 = vmatpush.lsf.bf16.msrb.mxu3 %v1445_v57 }
 0x17e   :  { %v1004_v21 = vmul.f32 %v2033_v16, %v965_v6  ;;  %vm987_vm13 = vcmp.gt.f32.partialorder %v965_v6, 0.0 }
 0x180   :  { %v1020_v35 = vsel %vm987_vm13, %v965_v6, %v1004_v21 }
 0x181   :  { %v824_v54 = vpop.f32.mrf.mxu3  ;;  %1479 = vmatpush.lsf.bf16.msrb.mxu3 %v1444_v43 }
 0x182   :  { %v825_v48 = vadd.f32 %v824_v54, %v2021_v39 }
 0x183   :  { %v966_v25 = vpop.f32.mrf.mxu2  ;;  %1480 = vllmr.2.mxu3 }
 0x184   :  { %v967_v40 = vadd.f32 %v966_v25, %v918_v24  ;;  %v920_v28 = vpop.f32.mrf.mxu1  ;;  %v874_v56 = vadd.f32 %v2048_v20, %v825_v48 }
 0x185   :  { %v921_v51 = vadd.f32 %v920_v28, %v872_v34 }
 0x186   :  { %vm988_vm14 = vcmp.gt.f32.partialorder %v967_v40, 0.0  ;;  %v1005_v53 = vmul.f32 %v2033_v16, %v967_v40 }
 0x188   :  { %v1021_v9 = vsel %vm988_vm14, %v967_v40, %v1005_v53 }
 0x189   :  { %v1046_v37 = vpack.c.bf16 %v1021_v9, %v1020_v35 }
 0x18b   :  { %v969_v42 = vpop.f32.mrf.mxu2 }
 0x18c   :  { %v922_v30 = vpop.f32.mrf.mxu1  ;;  %v970_v52 = vadd.f32 %v969_v42, %v921_v51 }
 0x18d   :  { %v923_v45 = vadd.f32 %v922_v30, %v874_v56 }
 0x18e   :  { %v1006_v39 = vmul.f32 %v2033_v16, %v970_v52  ;;  %vm989_vm15 = vcmp.gt.f32.partialorder %v970_v52, 0.0 }
 0x190   :  { %v1022_v20 = vsel %vm989_vm15, %v970_v52, %v1006_v39 }
 0x193   :  { %v971_v58 = vpop.f32.mrf.mxu2 }
 0x194   :  { %v972_v63 = vadd.f32 %v971_v58, %v923_v45 }
 0x196   :  { %vm990_vm0 = vcmp.gt.f32.partialorder %v972_v63, 0.0  ;;  %v1007_v61 = vmul.f32 %v2033_v16, %v972_v63  ;;  %v1048_v16 = vld [vmem:[%s2165_s5] sm:$0xff]  ;;  %s1146_s5 = sshll.u32 %s2166_s6, 4  ;;  %s1147_s5 = int_to_ptr.hbm [resolvable:$true] %s1146_s5 }
 0x197   :  { %1052 = vperm.xlu0 %1490, %v1048_v16  }
 0x198   :  { %v1023_v26 = vsel %vm990_vm0, %v972_v63, %v1007_v61 }
 0x199   :  { %v1047_v13 = vpack.c.bf16 %v1023_v26, %v1022_v20 }
 0x19b   :  { %1124 = vmatpush.bf16.xpose.msra.mxu3 %v1047_v13 }
 0x19f   :  { %1057 = vperm.xlu0 %1490, %v1049_v62  }
 0x1a3   :  { %1125 = vmatpush.bf16.xpose.msra.mxu3 %v1046_v37 }
 0x1ab   :  { %1126 = vmatpush.bf16.xpose.msra.mxu3 %v1045_v1 }
 0x1b3   :  { %1127 = vmatpush.bf16.xpose.msra.mxu3 %v1044_v17 }
 0x1bb   :  { %1128 = vmatpush.bf16.xpose.msra.mxu3 %v1043_v60 }
 0x1c3   :  { %1129 = vmatpush.bf16.xpose.msra.mxu3 %v1042_v4 }
 0x1cb   :  { %1130 = vmatpush.bf16.xpose.msra.mxu3 %v1041_v44 }
 0x1d3   :  { %1131 = vmatpush.bf16.xpose.msra.mxu3 %v1040_v32 }
 0x1da   :  { %1481 = vmatmul.lmr.bf16.vlgmr.msra.gmra.2.mxu3 }
 0x1e2   :  { %1482 = vmatmul.lmr.bf16.gmra.2.mxu3 }
 0x209   :  { %v1053_v2 = vpop.permute.xlu0 %1052 }
 0x211   :  { %v1058_v14 = vpop.permute.xlu0 %1057 }
 0x25d   :  { %v1133_v33 = vpop.f32.mrf.mxu3 }
 0x25e   :  { %v1134_v41 = vadd.f32 %v1133_v33, %v1053_v2 }
 0x260   :  { %1138 = vst [vmem:[#allocation6] sm:$0xff] %v1134_v41 }
 0x265   :  { %v1135_v3 = vpop.f32.mrf.mxu3 }
 0x266   :  { %v1136_v8 = vadd.f32 %v1135_v3, %v1058_v14 }
 0x268   :  { %1139 = vst [vmem:[#allocation6 + $0x8] sm:$0xff] %v1136_v8 }
 0x269   :  { %1152 = dma.vmem_to_hbm [thread:$0]  %s1145_s19, 256, %s1147_s5, [#allocation5], %s1549_s22, %s1549_s22, %s1550_s23  }
 0x26a   :  { %1542 = dma.done.wait [#allocation5], 256  }
 0x26b   :  { %1543 = vsyncadd [#allocation5], 4294967040 }
 0x26c   :  { %1157 = vsyncpa [#allocation4], 1 }
 0x26d   :  { %1158 = vsyncpa [#allocation5], 1 }

</bundles_post_ra>
